<compile_context>
chip_gen: v5e
topology: v5e:2x2
jax: 0.10.0
libtpu: 0.0.40
codegen_flags: <defaults>
</compile_context>

<pallas_src>
import math

import jax
import jax.numpy as jnp
from jax.experimental import pallas as pl
from jax.experimental.pallas import tpu as pltpu

_VMEM_LIMIT = 32 * 1024 * 1024   # explicit scoped-VMEM budget (v5e default is 16 MiB)


# ------------------------------- helpers ------------------------------------

def _cdiv(a, b):
    return (a + b - 1) // b


def _round_up(a, b):
    return _cdiv(a, b) * b


# ----------------------------- Pallas kernels -------------------------------

def _fused_kd_kernel(p_ref, w_ref, t_ref, o_ref):
    """y = patches @ W on the MXU (bf16 operands, f32 accumulation), immediately
    reduced to per-column sum((y - (y_hat - bias))^2) in a resident (1, NL) output."""
    @pl.when(pl.program_id(1) == 0)
    def _():
        o_ref[...] = jnp.zeros_like(o_ref)
    y = jnp.dot(p_ref[...], w_ref[...], preferred_element_type=jnp.float32)
    d = y - t_ref[...]
    o_ref[...] += jnp.sum(d * d, axis=0, keepdims=True)


def _per_level_sqsum_kernel(x_ref, t_ref, o_ref):
    """sum((x_hat[r] - target)^2) for ALL recon levels r from one streamed target tile.
    x: (R, TM, 128), t: (TM, 128), o: (R, 1, 128) resident accumulator."""
    @pl.when(pl.program_id(1) == 0)
    def _():
        o_ref[...] = jnp.zeros_like(o_ref)
    d = x_ref[...] - t_ref[...][None, :, :]
    o_ref[...] += jnp.sum(d * d, axis=1, keepdims=True)


def _log_sum_kernel(x_ref, o_ref):
    """Per-lane partial sums of log(x) into a resident (1, 128) output."""
    @pl.when(pl.program_id(1) == 0)
    def _():
        o_ref[...] = jnp.zeros_like(o_ref)
    o_ref[...] += jnp.sum(jnp.log(x_ref[...]), axis=0, keepdims=True)


# ----------------------------- kernel wrappers -------------------------------

def fused_encoder_kd_mse(target, y_hat_enh, y_hat_base,
                         w_enh, b_enh, w_base, b_base, stride):
    """kd_enh (and optionally kd_base) = mean((encoder(target) - y_hat)^2).

    Both encoders are packed lane-adjacent into one RHS so a single fused kernel
    computes both KD losses in one pass over the patches.
    """
    B, C, H, W = target.shape
    k = stride
    Hp, Wp = H // k, W // k
    M = B * Hp * Wp
    K = C * k * k
    Cy = w_enh.shape[0]
    has_base = w_base is not None
    packed_w = 2 * Cy if has_base else Cy
    # Natural (un-padded) lane width while narrow; 128-multiples once wide enough.
    NL = packed_w if packed_w <= 128 else _round_up(packed_w, 128)

    # Patch extraction (XLA glue).  bf16 halves the extra HBM stream it creates.
    # TODO(synk): fold this im2col into the kernel via NCHW-slab BlockSpecs.
    patches = (target.reshape(B, C, Hp, k, Wp, k)
                     .transpose(0, 2, 4, 1, 3, 5)
                     .reshape(M, K).astype(jnp.bfloat16))

    # Pack weights / distillation targets; fold the bias into the target so the
    # kernel does a pure matmul + diff (no per-step broadcast add).
    w_cols = [w_enh.reshape(Cy, K).T.astype(jnp.float32)]
    b_cols = [b_enh.astype(jnp.float32)]
    t_cols = [y_hat_enh.transpose(0, 2, 3, 1).reshape(M, Cy).astype(jnp.float32)]
    if has_base:
        w_cols.append(w_base.reshape(Cy, K).T.astype(jnp.float32))
        b_cols.append(b_base.astype(jnp.float32))
        t_cols.append(
            y_hat_base.transpose(0, 2, 3, 1).reshape(M, Cy).astype(jnp.float32))
    wmat = jnp.concatenate(w_cols, axis=1)                    # (K, packed_w)
    bias = jnp.concatenate(b_cols, axis=0)                    # (packed_w,)
    tmat = jnp.concatenate(t_cols, axis=1) - bias[None, :]    # (M, packed_w), bias folded
    if NL > packed_w:
        wmat = jnp.pad(wmat, ((0, 0), (0, NL - packed_w)))
        tmat = jnp.pad(tmat, ((0, 0), (0, NL - packed_w)))
    wmat = wmat.astype(jnp.bfloat16)     # bf16 MXU operand (flagged numerics change)

    # Row tiling: two "parallel" halves (keeps both v7x cores busy) x row tiles.
    # Padded rows are all-zero: (0 @ W) - 0 == 0, so they contribute nothing.
    TM = min(1024, _round_up(M, 8))
    tiles = _round_up(_cdiv(M, TM), 2)
    half = tiles // 2
    Mpad = tiles * TM
    if Mpad > M:
        patches = jnp.pad(patches, ((0, Mpad - M), (0, 0)))
        tmat = jnp.pad(tmat, ((0, Mpad - M), (0, 0)))

    colsums = pl.pallas_call(
        _fused_kd_kernel,
        out_shape=jax.ShapeDtypeStruct((2, 1, NL), jnp.float32),
        grid=(2, half),
        in_specs=[
            pl.BlockSpec((TM, K), lambda p, j: (p * half + j, 0)),
            pl.BlockSpec((K, NL), lambda p, j: (0, 0)),
            pl.BlockSpec((TM, NL), lambda p, j: (p * half + j, 0)),
        ],
        out_specs=pl.BlockSpec((None, 1, NL), lambda p, j: (p, 0, 0)),
        compiler_params=pltpu.CompilerParams(
            dimension_semantics=("parallel", "arbitrary"),
            vmem_limit_bytes=_VMEM_LIMIT),
        cost_estimate=pl.CostEstimate(
            flops=2 * Mpad * K * NL + 3 * Mpad * NL,
            transcendentals=0,
            bytes_accessed=2 * Mpad * K + 2 * K * NL + 4 * Mpad * NL + 8 * NL),
    )(patches, wmat, tmat)

    denom = float(M * Cy)                        # elements of one latent
    total = jnp.sum(colsums, axis=0)             # combine the two halves -> (1, NL)
    kd_enh = jnp.sum(total[0, :Cy]) / denom
    kd_base = jnp.sum(total[0, Cy:2 * Cy]) / denom if has_base else None
    return kd_enh, kd_base


def per_level_mse(x_hat, target):
    """mse_loss(extend_images, x_hat, reduction='none').mean(dim=(1,2,3,4)).

    The level dim R is folded into the block so the target is streamed once per
    core; per-level per-lane partial sums live in a resident (R, 1, 128) block."""
    R = x_hat.shape[0]
    D = target.size
    xf = x_hat.reshape(R, -1).astype(jnp.float32)
    tf = target.reshape(-1).astype(jnp.float32)

    rows = max(1, _cdiv(D, 128))
    TM = min(2048, _round_up(rows, 8))
    tiles = _round_up(_cdiv(rows, TM), 2)
    half = tiles // 2
    rows_pad = tiles * TM
    total = rows_pad * 128
    xf = jnp.pad(xf, ((0, 0), (0, total - D))).reshape(R, rows_pad, 128)
    tf = jnp.pad(tf, (0, total - D)).reshape(rows_pad, 128)

    out = pl.pallas_call(
        _per_level_sqsum_kernel,
        out_shape=jax.ShapeDtypeStruct((2, R, 1, 128), jnp.float32),
        grid=(2, half),
        in_specs=[
            pl.BlockSpec((R, TM, 128), lambda p, j: (0, p * half + j, 0)),
            pl.BlockSpec((TM, 128), lambda p, j: (p * half + j, 0)),
        ],
        out_specs=pl.BlockSpec((None, R, 1, 128), lambda p, j: (p, 0, 0, 0)),
        compiler_params=pltpu.CompilerParams(
            dimension_semantics=("parallel", "arbitrary"),
            vmem_limit_bytes=_VMEM_LIMIT),
        cost_estimate=pl.CostEstimate(
            flops=3 * R * total, transcendentals=0,
            bytes_accessed=4 * ((R + 1) * total + 2 * R * 128)),
    )(xf, tf)
    return jnp.sum(out, axis=(0, 2, 3)) / D       # shape (R,)


def log_sum(a):
    """sum(log(a)) via a gridded, lane-dense reduction (one call per source)."""
    flat = a.reshape(-1).astype(jnp.float32)
    n = flat.shape[0]
    rows = max(1, _cdiv(n, 128))
    TM = min(2048, _round_up(rows, 8))
    tiles = _round_up(_cdiv(rows, TM), 2)
    half = tiles // 2
    rows_pad = tiles * TM
    total = rows_pad * 128
    if total > n:
        flat = jnp.pad(flat, (0, total - n), constant_values=1.0)   # log(1) == 0
    data = flat.reshape(rows_pad, 128)

    out = pl.pallas_call(
        _log_sum_kernel,
        out_shape=jax.ShapeDtypeStruct((2, 1, 128), jnp.float32),
        grid=(2, half),
        in_specs=[pl.BlockSpec((TM, 128), lambda p, j: (p * half + j, 0))],
        out_specs=pl.BlockSpec((None, 1, 128), lambda p, j: (p, 0, 0)),
        compiler_params=pltpu.CompilerParams(
            dimension_semantics=("parallel", "arbitrary"),
            vmem_limit_bytes=_VMEM_LIMIT),
        cost_estimate=pl.CostEstimate(
            flops=total, transcendentals=total,
            bytes_accessed=4 * (total + 2 * 128)),
    )(data)
    return jnp.sum(out)


# ------------------------------ loss module ----------------------------------

class DistilledRateLoss:
    """JAX/Pallas port of DistilledRateLoss.

    Encoders (analysis transforms) are kernel==stride Conv2d layers given as
    `(weight, bias)` tuples; encoder forward + KD MSE run in one fused kernel.
    """

    def __init__(self, encoder_enhanced, encoder_base=None,
                 weight=255 ** 2, lmbda_list=(0.75,), stride=4):
        self.scalable_levels = len(lmbda_list)
        self.lmbda = jnp.asarray(lmbda_list, dtype=jnp.float32)
        self.weight = float(weight)
        self.weight_kd = 1.0
        self.stride = stride
        self.w_enh, self.b_enh = encoder_enhanced
        if encoder_base is not None:
            self.w_base, self.b_base = encoder_base
        else:
            self.w_base, self.b_base = None, None

    def __call__(self, output, target, lmbda=None):
        batch_size_images, _, H, W = target.shape
        out = {}
        num_pixels = batch_size_images * H * W

        # --- knowledge distillation (encoder matmul fused with MSE) ---------
        kd_enh, kd_base = fused_encoder_kd_mse(
            target, output['y_hat'][1],
            output['y_hat'][0] if self.w_base is not None else None,
            self.w_enh, self.b_enh, self.w_base, self.b_base, self.stride)
        out['kd_enh'] = kd_enh * self.weight_kd
        if kd_base is not None:
            out['kd_base'] = kd_base * self.weight_kd

        batch_size_recon = output['x_hat'].shape[0]
        if lmbda is None:
            lmbda = self.lmbda
        else:
            lmbda = jnp.asarray([lmbda], dtype=jnp.float32)

        # --- per-level reconstruction MSE (target broadcast over levels) ----
        out['mse_loss'] = per_level_mse(output['x_hat'], target)    # shape (R,)

        # --- rate terms --------------------------------------------------------
        denominator = -math.log(2) * num_pixels
        likelihoods = output['likelihoods']
        out['bpp_hype'] = log_sum(likelihoods['z']) / denominator
        # NOTE: the original's "'z_prog' in out.keys()" branch is dead code
        # (never true); reproduced by omission.
        out['bpp_base'] = log_sum(likelihoods['y']) / denominator   # squeeze(0) keeps the sum
        if 'y_prog' in likelihoods:
            out['bpp_scalable'] = log_sum(likelihoods['y_prog']) / denominator
        else:
            # original computes log(y).sum()/denominator * 0.0 == exactly 0.0
            out['bpp_scalable'] = jnp.float32(0.0)
        out['bpp_loss'] = (out['bpp_scalable'] + out['bpp_base']
                           + batch_size_recon * out['bpp_hype'])
        out['loss'] = out['bpp_loss'] + self.weight * (lmbda[-1] * out['kd_enh'])
        return out


# --------------------------------- main --------------------------------------

if __name__ == "__main__":
    key = jax.random.PRNGKey(0)
    keys = jax.random.split(key, 12)

    # Small shapes consistent with the forward pass.
    B, C, H, W = 2, 3, 16, 16      # images (NCHW)
    k = 4                          # encoder stride / kernel
    Cy = 8                         # latent channels
    Cz = 4                         # hyper-latent channels
    R = 2                          # number of reconstruction levels (x_hat dim 0)
    Hp, Wp = H // k, W // k        # 4, 4

    # Deterministic synthetic encoder parameters.
    w_enh = 0.1 * jax.random.normal(keys[0], (Cy, C, k, k), jnp.float32)
    b_enh = 0.1 * jax.random.normal(keys[1], (Cy,), jnp.float32)
    w_base = 0.1 * jax.random.normal(keys[2], (Cy, C, k, k), jnp.float32)
    b_base = 0.1 * jax.random.normal(keys[3], (Cy,), jnp.float32)

    # Example inputs.
    target = jax.random.uniform(keys[4], (B, C, H, W), jnp.float32)
    y_hat0 = jax.random.normal(keys[5], (B, Cy, Hp, Wp), jnp.float32)
    y_hat1 = jax.random.normal(keys[6], (B, Cy, Hp, Wp), jnp.float32)
    x_hat = jax.random.uniform(keys[7], (R, B, C, H, W), jnp.float32)
    lk_z = jax.random.uniform(keys[8], (B, Cz, Hp // 2, Wp // 2), jnp.float32,
                              minval=0.05, maxval=1.0)
    lk_y = jax.random.uniform(keys[9], (B, Cy, Hp, Wp), jnp.float32,
                              minval=0.05, maxval=1.0)
    lk_y_prog = jax.random.uniform(keys[10], (1, B, Cy, Hp, Wp), jnp.float32,
                                   minval=0.05, maxval=1.0)

    output = {
        'y_hat': [y_hat0, y_hat1],
        'x_hat': x_hat,
        'likelihoods': {'z': lk_z, 'y': lk_y, 'y_prog': lk_y_prog},
    }

    loss_mod = DistilledRateLoss((w_enh, b_enh), encoder_base=(w_base, b_base),
                                 weight=255 ** 2, lmbda_list=[0.75], stride=k)

    loss_fn = jax.jit(lambda out_d, tgt: loss_mod(out_d, tgt))
    out = loss_fn(output, target)
    jax.block_until_ready(out['loss'])
    jax.block_until_ready(out['mse_loss'])
    print("KERNEL_OK")
</pallas_src>

<mosaic_0001>
module attributes {stable_mosaic.version = 11 : i64} {
  func.func @_log_sum_kernel(%arg0: i32, %arg1: i32, %arg2: memref<8x128xf32, #tpu.memory_space<vmem>>, %arg3: memref<1x1x128xf32, #tpu.memory_space<vmem>>) attributes {dimension_semantics = [#tpu.dimension_semantics<parallel>, #tpu.dimension_semantics<arbitrary>], iteration_bounds = array<i64: 2, 1>, scalar_prefetch = 0 : i64, scratch_operands = 0 : i64, tpu.core_type = #tpu.core_type<tc>, window_params = [{transform_indices = @transform_0, window_bounds = array<i64: 8, 128>}, {transform_indices = @transform_1, window_bounds = array<i64: 1, 1, 128>}]} {
    %c0_i32 = arith.constant 0 : i32
    %0 = arith.cmpi eq, %arg1, %c0_i32 : i32
    %1 = arith.extui %0 : i1 to i32
    %c0_i32_0 = arith.constant 0 : i32
    %2 = arith.cmpi ne, %1, %c0_i32_0 : i32
    scf.if %2 {
      %cst_8 = arith.constant 0.000000e+00 : f32
      %13 = vector.broadcast %cst_8 : f32 to vector<1x128xf32>
      %c0_9 = arith.constant 0 : index
      %c0_10 = arith.constant 0 : index
      %c0_11 = arith.constant 0 : index
      %14 = vector.load %arg3[%c0_9, %c0_10, %c0_11] : memref<1x1x128xf32, #tpu.memory_space<vmem>>, vector<1x1x128xf32>
      %15 = vector.shape_cast %14 : vector<1x1x128xf32> to vector<1x128xf32>
      %16 = vector.shape_cast %13 : vector<1x128xf32> to vector<1x1x128xf32>
      tpu.vector_store %arg3[%c0_9, %c0_10, %c0_11], %16 {strides = array<i32>} : memref<1x1x128xf32, #tpu.memory_space<vmem>>, vector<1x1x128xf32>,
    } else {
    }
    %c0 = arith.constant 0 : index
    %c0_1 = arith.constant 0 : index
    %c0_2 = arith.constant 0 : index
    %3 = vector.load %arg3[%c0, %c0_1, %c0_2] : memref<1x1x128xf32, #tpu.memory_space<vmem>>, vector<1x1x128xf32>
    %4 = vector.shape_cast %3 : vector<1x1x128xf32> to vector<1x128xf32>
    %c0_3 = arith.constant 0 : index
    %c0_4 = arith.constant 0 : index
    %5 = vector.load %arg2[%c0_3, %c0_4] : memref<8x128xf32, #tpu.memory_space<vmem>>, vector<8x128xf32>
    %6 = math.log %5 : vector<8x128xf32>
    %cst = arith.constant dense<0.000000e+00> : vector<128xf32>
    %7 = vector.multi_reduction <add>, %6, %cst [0] : vector<8x128xf32> to vector<128xf32>
    %8 = vector.shape_cast %7 : vector<128xf32> to vector<1x128xf32>
    %9 = arith.addf %4, %8 : vector<1x128xf32>
    %c0_5 = arith.constant 0 : index
    %c0_6 = arith.constant 0 : index
    %c0_7 = arith.constant 0 : index
    %10 = vector.load %arg3[%c0_5, %c0_6, %c0_7] : memref<1x1x128xf32, #tpu.memory_space<vmem>>, vector<1x1x128xf32>
    %11 = vector.shape_cast %10 : vector<1x1x128xf32> to vector<1x128xf32>
    %12 = vector.shape_cast %9 : vector<1x128xf32> to vector<1x1x128xf32>
    tpu.vector_store %arg3[%c0_5, %c0_6, %c0_7], %12 {strides = array<i32>} : memref<1x1x128xf32, #tpu.memory_space<vmem>>, vector<1x1x128xf32>,
    return
  }
  func.func @transform_0(%arg0: i32, %arg1: i32) -> (i32, i32) {
    %c1_i32 = arith.constant 1 : i32
    %0 = arith.muli %arg0, %c1_i32 : i32
    %1 = arith.addi %0, %arg1 : i32
    %c0_i32 = arith.constant 0 : i32
    %c0_i32_0 = arith.constant 0 : i32
    return %1, %c0_i32 : i32, i32
  }
  func.func @transform_1(%arg0: i32, %arg1: i32) -> (i32, i32, i32) {
    %c0_i32 = arith.constant 0 : i32
    %c0_i32_0 = arith.constant 0 : i32
    %c0_i32_1 = arith.constant 0 : i32
    return %arg0, %c0_i32, %c0_i32_0 : i32, i32, i32
  }
}

module attributes {stable_mosaic.version = 11 : i64} {
  func.func @_fused_kd_kernel(%arg0: i32, %arg1: i32, %arg2: memref<32x48xbf16, #tpu.memory_space<vmem>>, %arg3: memref<48x16xbf16, #tpu.memory_space<vmem>>, %arg4: memref<32x16xf32, #tpu.memory_space<vmem>>, %arg5: memref<1x1x16xf32, #tpu.memory_space<vmem>>) attributes {dimension_semantics = [#tpu.dimension_semantics<parallel>, #tpu.dimension_semantics<arbitrary>], iteration_bounds = array<i64: 2, 1>, scalar_prefetch = 0 : i64, scratch_operands = 0 : i64, tpu.core_type = #tpu.core_type<tc>, window_params = [{transform_indices = @transform_0, window_bounds = array<i64: 32, 48>}, {pipeline_mode = #tpu.pipeline_mode<synchronous>, transform_indices = @transform_1, window_bounds = array<i64: 48, 16>}, {transform_indices = @transform_2, window_bounds = array<i64: 32, 16>}, {transform_indices = @transform_3, window_bounds = array<i64: 1, 1, 16>}]} {
    %c0_i32 = arith.constant 0 : i32
    %0 = arith.cmpi eq, %arg1, %c0_i32 : i32
    %1 = arith.extui %0 : i1 to i32
    %c0_i32_0 = arith.constant 0 : i32
    %2 = arith.cmpi ne, %1, %c0_i32_0 : i32
    scf.if %2 {
      %cst_13 = arith.constant 0.000000e+00 : f32
      %17 = vector.broadcast %cst_13 : f32 to vector<1x16xf32>
      %c0_14 = arith.constant 0 : index
      %c0_15 = arith.constant 0 : index
      %c0_16 = arith.constant 0 : index
      %18 = vector.load %arg5[%c0_14, %c0_15, %c0_16] : memref<1x1x16xf32, #tpu.memory_space<vmem>>, vector<1x1x16xf32>
      %19 = vector.shape_cast %18 : vector<1x1x16xf32> to vector<1x16xf32>
      %20 = vector.shape_cast %17 : vector<1x16xf32> to vector<1x1x16xf32>
      tpu.vector_store %arg5[%c0_14, %c0_15, %c0_16], %20 {strides = array<i32>} : memref<1x1x16xf32, #tpu.memory_space<vmem>>, vector<1x1x16xf32>,
    } else {
    }
    %c0 = arith.constant 0 : index
    %c0_1 = arith.constant 0 : index
    %3 = vector.load %arg2[%c0, %c0_1] : memref<32x48xbf16, #tpu.memory_space<vmem>>, vector<32x48xbf16>
    %c0_2 = arith.constant 0 : index
    %c0_3 = arith.constant 0 : index
    %4 = vector.load %arg3[%c0_2, %c0_3] : memref<48x16xbf16, #tpu.memory_space<vmem>>, vector<48x16xbf16>
    %cst = arith.constant dense<0.000000e+00> : vector<32x16xf32>
    %5 = tpu.matmul %3, %4, %cst {dimension_numbers = #tpu.dot_dimension_numbers<[1], [0], [0], [1], [0, 0, 1, 1], [], []>} : vector<32x48xbf16>, vector<48x16xbf16>, vector<32x16xf32> -> vector<32x16xf32>
    %c0_4 = arith.constant 0 : index
    %c0_5 = arith.constant 0 : index
    %6 = vector.load %arg4[%c0_4, %c0_5] : memref<32x16xf32, #tpu.memory_space<vmem>>, vector<32x16xf32>
    %7 = arith.subf %5, %6 : vector<32x16xf32>
    %c0_6 = arith.constant 0 : index
    %c0_7 = arith.constant 0 : index
    %c0_8 = arith.constant 0 : index
    %8 = vector.load %arg5[%c0_6, %c0_7, %c0_8] : memref<1x1x16xf32, #tpu.memory_space<vmem>>, vector<1x1x16xf32>
    %9 = vector.shape_cast %8 : vector<1x1x16xf32> to vector<1x16xf32>
    %10 = arith.mulf %7, %7 : vector<32x16xf32>
    %cst_9 = arith.constant dense<0.000000e+00> : vector<16xf32>
    %11 = vector.multi_reduction <add>, %10, %cst_9 [0] : vector<32x16xf32> to vector<16xf32>
    %12 = vector.shape_cast %11 : vector<16xf32> to vector<1x16xf32>
    %13 = arith.addf %9, %12 : vector<1x16xf32>
    %c0_10 = arith.constant 0 : index
    %c0_11 = arith.constant 0 : index
    %c0_12 = arith.constant 0 : index
    %14 = vector.load %arg5[%c0_10, %c0_11, %c0_12] : memref<1x1x16xf32, #tpu.memory_space<vmem>>, vector<1x1x16xf32>
    %15 = vector.shape_cast %14 : vector<1x1x16xf32> to vector<1x16xf32>
    %16 = vector.shape_cast %13 : vector<1x16xf32> to vector<1x1x16xf32>
    tpu.vector_store %arg5[%c0_10, %c0_11, %c0_12], %16 {strides = array<i32>} : memref<1x1x16xf32, #tpu.memory_space<vmem>>, vector<1x1x16xf32>,
    return
  }
  func.func @transform_0(%arg0: i32, %arg1: i32) -> (i32, i32) {
    %c1_i32 = arith.constant 1 : i32
    %0 = arith.muli %arg0, %c1_i32 : i32
    %1 = arith.addi %0, %arg1 : i32
    %c0_i32 = arith.constant 0 : i32
    %c0_i32_0 = arith.constant 0 : i32
    return %1, %c0_i32 : i32, i32
  }
  func.func @transform_1(%arg0: i32, %arg1: i32) -> (i32, i32) {
    %c0_i32 = arith.constant 0 : i32
    %c0_i32_0 = arith.constant 0 : i32
    %c0_i32_1 = arith.constant 0 : i32
    return %c0_i32, %c0_i32_0 : i32, i32
  }
  func.func @transform_2(%arg0: i32, %arg1: i32) -> (i32, i32) {
    %c1_i32 = arith.constant 1 : i32
    %0 = arith.muli %arg0, %c1_i32 : i32
    %1 = arith.addi %0, %arg1 : i32
    %c0_i32 = arith.constant 0 : i32
    %c0_i32_0 = arith.constant 0 : i32
    return %1, %c0_i32 : i32, i32
  }
  func.func @transform_3(%arg0: i32, %arg1: i32) -> (i32, i32, i32) {
    %c0_i32 = arith.constant 0 : i32
    %c0_i32_0 = arith.constant 0 : i32
    %c0_i32_1 = arith.constant 0 : i32
    return %arg0, %c0_i32, %c0_i32_0 : i32, i32, i32
  }
}

module attributes {stable_mosaic.version = 11 : i64} {
  func.func @_per_level_sqsum_kernel(%arg0: i32, %arg1: i32, %arg2: memref<2x16x128xf32, #tpu.memory_space<vmem>>, %arg3: memref<16x128xf32, #tpu.memory_space<vmem>>, %arg4: memref<1x2x1x128xf32, #tpu.memory_space<vmem>>) attributes {dimension_semantics = [#tpu.dimension_semantics<parallel>, #tpu.dimension_semantics<arbitrary>], iteration_bounds = array<i64: 2, 1>, scalar_prefetch = 0 : i64, scratch_operands = 0 : i64, tpu.core_type = #tpu.core_type<tc>, window_params = [{transform_indices = @transform_0, window_bounds = array<i64: 2, 16, 128>}, {transform_indices = @transform_1, window_bounds = array<i64: 16, 128>}, {transform_indices = @transform_2, window_bounds = array<i64: 1, 2, 1, 128>}]} {
    %c0_i32 = arith.constant 0 : i32
    %0 = arith.cmpi eq, %arg1, %c0_i32 : i32
    %1 = arith.extui %0 : i1 to i32
    %c0_i32_0 = arith.constant 0 : i32
    %2 = arith.cmpi ne, %1, %c0_i32_0 : i32
    scf.if %2 {
      %cst_13 = arith.constant 0.000000e+00 : f32
      %17 = vector.broadcast %cst_13 : f32 to vector<2x1x128xf32>
      %c0_14 = arith.constant 0 : index
      %c0_15 = arith.constant 0 : index
      %c0_16 = arith.constant 0 : index
      %c0_17 = arith.constant 0 : index
      %18 = vector.load %arg4[%c0_14, %c0_15, %c0_16, %c0_17] : memref<1x2x1x128xf32, #tpu.memory_space<vmem>>, vector<1x2x1x128xf32>
      %19 = vector.shape_cast %18 : vector<1x2x1x128xf32> to vector<2x1x128xf32>
      %20 = vector.shape_cast %17 : vector<2x1x128xf32> to vector<1x2x1x128xf32>
      tpu.vector_store %arg4[%c0_14, %c0_15, %c0_16, %c0_17], %20 {strides = array<i32>} : memref<1x2x1x128xf32, #tpu.memory_space<vmem>>, vector<1x2x1x128xf32>,
    } else {
    }
    %c0 = arith.constant 0 : index
    %c0_1 = arith.constant 0 : index
    %c0_2 = arith.constant 0 : index
    %3 = vector.load %arg2[%c0, %c0_1, %c0_2] : memref<2x16x128xf32, #tpu.memory_space<vmem>>, vector<2x16x128xf32>
    %c0_3 = arith.constant 0 : index
    %c0_4 = arith.constant 0 : index
    %4 = vector.load %arg3[%c0_3, %c0_4] : memref<16x128xf32, #tpu.memory_space<vmem>>, vector<16x128xf32>
    %5 = vector.shape_cast %4 : vector<16x128xf32> to vector<1x16x128xf32>
    %6 = vector.broadcast %5 : vector<1x16x128xf32> to vector<2x16x128xf32>
    %7 = arith.subf %3, %6 : vector<2x16x128xf32>
    %c0_5 = arith.constant 0 : index
    %c0_6 = arith.constant 0 : index
    %c0_7 = arith.constant 0 : index
    %c0_8 = arith.constant 0 : index
    %8 = vector.load %arg4[%c0_5, %c0_6, %c0_7, %c0_8] : memref<1x2x1x128xf32, #tpu.memory_space<vmem>>, vector<1x2x1x128xf32>
    %9 = vector.shape_cast %8 : vector<1x2x1x128xf32> to vector<2x1x128xf32>
    %10 = arith.mulf %7, %7 : vector<2x16x128xf32>
    %cst = arith.constant dense<0.000000e+00> : vector<2x128xf32>
    %11 = vector.multi_reduction <add>, %10, %cst [1] : vector<2x16x128xf32> to vector<2x128xf32>
    %12 = vector.shape_cast %11 : vector<2x128xf32> to vector<2x1x128xf32>
    %13 = arith.addf %9, %12 : vector<2x1x128xf32>
    %c0_9 = arith.constant 0 : index
    %c0_10 = arith.constant 0 : index
    %c0_11 = arith.constant 0 : index
    %c0_12 = arith.constant 0 : index
    %14 = vector.load %arg4[%c0_9, %c0_10, %c0_11, %c0_12] : memref<1x2x1x128xf32, #tpu.memory_space<vmem>>, vector<1x2x1x128xf32>
    %15 = vector.shape_cast %14 : vector<1x2x1x128xf32> to vector<2x1x128xf32>
    %16 = vector.shape_cast %13 : vector<2x1x128xf32> to vector<1x2x1x128xf32>
    tpu.vector_store %arg4[%c0_9, %c0_10, %c0_11, %c0_12], %16 {strides = array<i32>} : memref<1x2x1x128xf32, #tpu.memory_space<vmem>>, vector<1x2x1x128xf32>,
    return
  }
  func.func @transform_0(%arg0: i32, %arg1: i32) -> (i32, i32, i32) {
    %c1_i32 = arith.constant 1 : i32
    %0 = arith.muli %arg0, %c1_i32 : i32
    %1 = arith.addi %0, %arg1 : i32
    %c0_i32 = arith.constant 0 : i32
    %c0_i32_0 = arith.constant 0 : i32
    %c0_i32_1 = arith.constant 0 : i32
    return %c0_i32, %1, %c0_i32_0 : i32, i32, i32
  }
  func.func @transform_1(%arg0: i32, %arg1: i32) -> (i32, i32) {
    %c1_i32 = arith.constant 1 : i32
    %0 = arith.muli %arg0, %c1_i32 : i32
    %1 = arith.addi %0, %arg1 : i32
    %c0_i32 = arith.constant 0 : i32
    %c0_i32_0 = arith.constant 0 : i32
    return %1, %c0_i32 : i32, i32
  }
  func.func @transform_2(%arg0: i32, %arg1: i32) -> (i32, i32, i32, i32) {
    %c0_i32 = arith.constant 0 : i32
    %c0_i32_0 = arith.constant 0 : i32
    %c0_i32_1 = arith.constant 0 : i32
    %c0_i32_2 = arith.constant 0 : i32
    return %arg0, %c0_i32, %c0_i32_0, %c0_i32_1 : i32, i32, i32, i32
  }
}

</mosaic_0001>

<bundles_post_ra>
// kernel: _lambda_.8
= control target key start
LH: loop header
LB: loop body
LE: loop exit
PB: predicated region body
PF: predicated region fallthrough
CT: control target
= control target key end

     0   :  { %s271_s6 = smov 0   ;;  %s273_s7 = smov 0   ;;  %s301_s0 = inlined_call_operand.vmem [shape: f32[16,128], index: 0, kind: input, shape index: {}]   ;;  %s302_s1 = inlined_call_operand.vmem [shape: f32[2,1,128], index: 1, kind: output, shape index: {}]  }
   0x1   :  { %s275_s8 = smov 0  }
   0x2 LB: > { %s23_s9 = sadd.s32 1, %s254_s7  ;;  %p205_p0 = scmp.ge.s32.totalorder %s258_s8, 1  ;;  %s258_s8 = sphi %s275_s8, %s11_s8   ;;  %s254_s7 = sphi %s273_s7, %s304_s7   ;;  %s250_s6 = sphi %s271_s6, %s303_s6  }
   0x3   : > { %p25_p1 = scmp.ge.s32.totalorder %s23_s9, 2  ;;  %p102_p2 = scmp.lt.s32.totalorder %s258_s8, 3 }
   0x5   : > { %s306_s9 = smov (%p25_p1, %s23_s9), 0  ;;  %p103_p3 = pnand %p205_p0, %p102_p2 }
   0x6   : > { %p121_p4 = scmp.lt.s32.totalorder (!%p103_p3), %s250_s6, 1 }
   0x7   : > { %106 = sbr.rel (%p103_p3) target bundleno = 40 (0x28), region = 24 }
   0xc   : > { %s308_s6 = smov (!%p121_p4, %s250_s6), 1  ;;  %v260_v0 = vmov 0.0  }
   0xd   : > { %s206_s10 = sshll.u32 %s308_s6, 3  ;;  %s128_s13 = scalar_lea.vmem %s302_s1, %s308_s6 }
   0xe   : > { %s124_s16 = scalar_lea.vmem %s301_s0, %s206_s10  ;;  %133 = vst [vmem:[%s128_s13] sm:$0x1] %v260_v0 }
   0xf   : > { %v135_v1 = vld [vmem:[%s124_s16] sm:$0xff] }
  0x10   : > { %234 = vlog2.f32 %v135_v1 }
  0x15   : > { %v134_v9 = vld [vmem:[%s128_s13] sm:$0x1] }
  0x16   : > { %v235_v2 = vpop.eup %234 }
  0x17   : > { %v137_v3 = vmul.f32 0.6931472, %v235_v2 }
  0x19   : > { %v138_v4 = vrot.slane %v137_v3, 4 }
  0x1b   : > { %v139_v5 = vadd.f32 %v138_v4, %v137_v3 }
  0x1d   : > { %v140_v6 = vrot.slane %v139_v5, 2 }
  0x1f   : > { %v141_v7 = vadd.f32 %v140_v6, %v139_v5 }
  0x21   : > { %v142_v8 = vrot.slane %v141_v7, 1 }
  0x23   : > { %v143_v10 = vadd.f32 %v142_v8, %v141_v7 }
  0x25   : > { %v144_v11 = vadd.f32 %v143_v10, %v134_v9 }
  0x27   : > { %145 = vst [vmem:[%s128_s13] sm:$0x1] %v144_v11 }
  0x28 PF: > { %s11_s8 = sadd.s32 1, %s258_s8   ;;  %s303_s6 = smov %s254_s7 }
  0x29   : > { %p8_p5 = scmp.ge.s32.totalorder %s11_s8, 4   ;;  %s304_s7 = smov %s306_s9 }
  0x2b   :  { %10 = sbr.rel (!%p8_p5) target bundleno = 2 (0x2), region = 58 }

// kernel: _lambda_.5
= control target key start
LH: loop header
LB: loop body
LE: loop exit
PB: predicated region body
PF: predicated region fallthrough
CT: control target
= control target key end

     0   :  { %s496_s12 = smov 0   ;;  %s498_s13 = smov 0   ;;  %s553_s0 = inlined_call_operand.vmem [shape: bf16[64,48], index: 0, kind: input, shape index: {}]   ;;  %s554_s1 = inlined_call_operand.vmem [shape: bf16[48,16], index: 1, kind: input, shape index: {}]   ;;  %s555_s2 = inlined_call_operand.vmem [shape: f32[64,16], index: 2, kind: input, shape index: {}]   ;;  %s556_s3 = inlined_call_operand.vmem [shape: f32[2,1,16], index: 3, kind: output, shape index: {}]  }
   0x1   :  { %s500_s14 = smov 0  }
   0x2 LB: > { %s25_s15 = sadd.s32 1, %s469_s13  ;;  %p389_p0 = scmp.ge.s32.totalorder %s473_s14, 1  ;;  %s473_s14 = sphi %s500_s14, %s13_s14   ;;  %s469_s13 = sphi %s498_s13, %s558_s13   ;;  %s465_s12 = sphi %s496_s12, %s557_s12  }
   0x3   : > { %p27_p1 = scmp.ge.s32.totalorder %s25_s15, 2  ;;  %p169_p2 = scmp.lt.s32.totalorder %s473_s14, 3 }
   0x5   : > { %s560_s15 = smov (%p27_p1, %s25_s15), 0  ;;  %p170_p3 = pnand %p389_p0, %p169_p2 }
   0x6   : > { %s390_s18 = sshll.u32 (!%p170_p3), %s465_s12, 2  ;;  %p214_p5 = scmp.lt.s32.totalorder (!%p170_p3), %s465_s12, 1 }
   0x7   : > { %173 = sbr.rel (%p170_p3) target bundleno = 184 (0xb8), region = 32  ;;  %p200_p4 = scmp.lt.s32.totalorder (!%p170_p3), %s390_s18, 7 }
   0xc   : > { %v422_v0 = vld [vmem:[%s554_s1 + $0x10] sm:$0xff]  ;;  %v421_v1 = vld [vmem:[%s554_s1 + $0x8] sm:$0xff]  ;;  %s562_s18 = smov (!%p200_p4, %s390_s18), 7  ;;  %v420_v2 = vld [vmem:[%s554_s1] sm:$0xff]  ;;  %vm262_vm0 = vcmask 392192   ;;  %s564_s12 = smov (!%p214_p5, %s465_s12), 1 }
   0xd   : > { %274 = vmatpush.bf16.msra.mxu0 %v422_v0  ;;  %423 = vmatpush.bf16.msra.mxu1 %v422_v0  ;;  %s391_s21 = sshll.u32 %s562_s18, 2  ;;  %s534_s29 = scalar_lea.vmem %s556_s3, %s564_s12  ;;  %vm222_vm1 = vcmask 122880   ;;  %v475_v5 = vmov 0.0   ;;  %vm301_vm2 = vcmask 130048  }
   0xe   : > { %s203_s26 = scalar_lea.vmem %s553_s0, %s391_s21  ;;  %223 = vst.msk [vmem:[%s534_s29] sm:$0x1] %vm222_vm1, %v475_v5  ;;  %s393_s30 = sshll.u32 %s562_s18, 3 }
   0xf   : > { %v418_v3 = vld [vmem:[%s203_s26] sm:$0xff]  ;;  %v419_v4 = vld [vmem:[%s203_s26 + $0x8] sm:$0xff]  ;;  %s211_s6 = scalar_lea.vmem %s555_s2, %s393_s30 }
  0x10   : > { %v288_v8 = vld [vmem:[%s211_s6] sm:$0xff]  ;;  %v290_v9 = vld [vmem:[%s211_s6 + $0x10] sm:$0xff]  ;;  %v289_v11 = vld [vmem:[%s211_s6 + $0x8] sm:$0xff] }
  0x11   : > { %275 = vmatpush.bf16.msra.mxu0 %v421_v1  ;;  %424 = vmatpush.bf16.msra.mxu1 %v421_v1  ;;  %v291_v12 = vld [vmem:[%s211_s6 + $0x18] sm:$0xff] }
  0x15   : > { %276 = vmatpush.bf16.msra.mxu0 %v420_v2  ;;  %425 = vmatpush.bf16.msra.mxu1 %v420_v2  ;;  %v296_v34 = vld [vmem:[%s534_s29] sm:$0x1] }
  0x18   : > { %414 = vmatmul.msk.bf16.vlgmr.msra.gmra.mxu0 %vm262_vm0, %v418_v3  ;;  %415 = vmatmul.msk.bf16.vlgmr.msra.gmra.mxu1 %vm262_vm0, %v419_v4 }
  0x95   : > { %v278_v6 = vpop.f32.mrf.mxu0  ;;  %v283_v7 = vpop.f32.mrf.mxu1 }
  0x96   : > { %v292_v10 = vsub.f32 %v278_v6, %v288_v8  ;;  %v294_v13 = vsub.f32 %v283_v7, %v290_v9 }
  0x98   : > { %v297_v16 = vmul.f32 %v292_v10, %v292_v10  ;;  %v299_v19 = vmul.f32 %v294_v13, %v294_v13 }
  0x9a   : > { %v302_v21 = vsel %vm301_vm2, %v297_v16, 0.0  ;;  %v305_v25 = vsel %vm301_vm2, %v299_v19, 0.0 }
  0x9d   : > { %v280_v14 = vpop.f32.mrf.mxu0  ;;  %v285_v15 = vpop.f32.mrf.mxu1 }
  0x9e   : > { %v293_v17 = vsub.f32 %v280_v14, %v289_v11  ;;  %v295_v18 = vsub.f32 %v285_v15, %v291_v12 }
  0xa0   : > { %v298_v20 = vmul.f32 %v293_v17, %v293_v17  ;;  %v300_v23 = vmul.f32 %v295_v18, %v295_v18 }
  0xa2   : > { %v303_v22 = vsel %vm301_vm2, %v298_v20, 0.0  ;;  %v307_v27 = vsel %vm301_vm2, %v300_v23, 0.0 }
  0xa3   : > { %v304_v24 = vadd.f32 %v303_v22, %v302_v21 }
  0xa5   : > { %v306_v26 = vadd.f32 %v305_v25, %v304_v24 }
  0xa7   : > { %v308_v28 = vadd.f32 %v307_v27, %v306_v26 }
  0xa9   : > { %v309_v29 = vrot.slane %v308_v28, 4 }
  0xab   : > { %v310_v30 = vadd.f32 %v309_v29, %v308_v28 }
  0xad   : > { %v311_v31 = vrot.slane %v310_v30, 2 }
  0xaf   : > { %v312_v32 = vadd.f32 %v311_v31, %v310_v30 }
  0xb1   : > { %v313_v33 = vrot.slane %v312_v32, 1 }
  0xb3   : > { %v314_v35 = vadd.f32 %v313_v33, %v312_v32 }
  0xb5   : > { %v315_v36 = vadd.f32 %v314_v35, %v296_v34 }
  0xb7   : > { %317 = vst.msk [vmem:[%s534_s29] sm:$0x1] %vm222_vm1, %v315_v36 }
  0xb8 PF: > { %s13_s14 = sadd.s32 1, %s473_s14   ;;  %s557_s12 = smov %s469_s13 }
  0xb9   : > { %p10_p6 = scmp.ge.s32.totalorder %s13_s14, 4   ;;  %s558_s13 = smov %s560_s15 }
  0xbb   :  { %12 = sbr.rel (!%p10_p6) target bundleno = 2 (0x2), region = 69 }

// kernel: _lambda_.6
= control target key start
LH: loop header
LB: loop body
LE: loop exit
PB: predicated region body
PF: predicated region fallthrough
CT: control target
= control target key end

     0   :  { %s468_s9 = smov 0   ;;  %s470_s10 = smov 0   ;;  %s546_s0 = inlined_call_operand.vmem [shape: f32[2,32,128], index: 0, kind: input, shape index: {}]   ;;  %s547_s1 = inlined_call_operand.vmem [shape: f32[32,128], index: 1, kind: input, shape index: {}]   ;;  %s548_s2 = inlined_call_operand.vmem [shape: f32[2,2,1,128], index: 2, kind: output, shape index: {}]  }
   0x1   :  { %s472_s11 = smov 0   ;;  %s474_s12 = smov 0  }
   0x2   :  { %s476_s13 = smov 0  }
   0x3 LB: > { %s24_s14 = sadd.s32 1, %s446_s12  ;;  %p40_p1 = scmp.ne.s32.totalorder %s438_s10, %s434_s9  ;;  %s450_s13 = sphi %s476_s13, %s12_s13   ;;  %s446_s12 = sphi %s474_s12, %s552_s12   ;;  %s442_s11 = sphi %s472_s11, %s551_s11   ;;  %s438_s10 = sphi %s470_s10, %s550_s10   ;;  %s434_s9 = sphi %s468_s9, %s549_s9  }
   0x4   : > { %p26_p0 = scmp.ge.s32.totalorder %s24_s14, 2  ;;  %p41_p2 = scmp.eq.s32.totalorder %s450_s13, 0 }
   0x5   : > { %s33_s16 = sadd.s32 1, %s438_s10  ;;  %p359_p5 = scmp.ge.s32.totalorder %s450_s13, 2 }
   0x6   : > { %s554_s14 = smov (%p26_p0, %s24_s14), 0  ;;  %p42_p3 = por %p41_p2, %p40_p1 }
   0x7   : > { %s30_s15 = ssub.s32 %s446_s12, %s554_s14  ;;  %120 = sbr.rel (%p359_p5) target bundleno = 20 (0x14), region = 16 }
   0x8   : > { %p31_p4 = scmp.eq.s32.totalorder %s30_s15, 0 }
   0xa   : > { %s503_s17 = scalar_select %p31_p4, %s438_s10, %s33_s16  }
   0xc   : > { %123 = sbr.rel (!%p42_p3) target bundleno = 20 (0x14), region = 20  ;;  %s125_s18 = sand.u32 (%p42_p3), 1, %s438_s10  }
   0xd   : > { %s370_s19 = sshll.u32 (%p42_p3), %s446_s12, 4  ;;  %s360_s20 = sshll.u32 (%p42_p3), %s125_s18, 5 }
   0xe   : > { %s131_s23 = scalar_lea.vmem (%p42_p3), %s546_s0, %s370_s19  ;;  %s127_s24 = scalar_lea.vmem (%p42_p3), [#allocation2], %s360_s20 }
   0xf   : > { %v166_v0 = vld [vmem:[%s131_s23] sm:$0xff] (%p42_p3)  ;;  %v168_v1 = vld [vmem:[%s131_s23 + $0x8] sm:$0xff] (%p42_p3) }
  0x10   : > { %v170_v2 = vld [vmem:[%s131_s23 + $0x20] sm:$0xff] (%p42_p3)  ;;  %167 = vst [vmem:[%s127_s24] sm:$0xff] (%p42_p3), %v166_v0  ;;  %v172_v3 = vld [vmem:[%s131_s23 + $0x28] sm:$0xff] (%p42_p3) }
  0x11   : > { %169 = vst [vmem:[%s127_s24 + $0x8] sm:$0xff] %v168_v1 }
  0x12   : > { %171 = vst [vmem:[%s127_s24 + $0x10] sm:$0xff] %v170_v2 }
  0x13   : > { %173 = vst [vmem:[%s127_s24 + $0x18] sm:$0xff] %v172_v3 }
  0x14 PF: > { %p363_p6 = scmp.ge.s32.totalorder %s450_s13, 1  ;;  %p189_p7 = scmp.lt.s32.totalorder %s450_s13, 3 }
  0x16   : > { %p190_p8 = pnand %p363_p6, %p189_p7 }
  0x17   : > { %p232_p9 = scmp.lt.s32.totalorder (!%p190_p8), %s442_s11, 1  ;;  %s196_s25 = sand.u32 (!%p190_p8), 1, %s434_s9  }
  0x18   : > { %193 = sbr.rel (%p190_p8) target bundleno = 55 (0x37), region = 62  ;;  %s364_s26 = sshll.u32 (!%p190_p8), %s196_s25, 5 }
  0x19   : > { %s365_s27 = sshll.u32 (!%p190_p8), %s442_s11, 1  ;;  %s198_s4 = scalar_lea.vmem (!%p190_p8), [#allocation2], %s364_s26 }
  0x1a   : > { %p226_p10 = scmp.lt.s32.totalorder (!%p190_p8), %s365_s27, 3 }
  0x1d   : > { %s556_s11 = smov (!%p232_p9, %s442_s11), 1  ;;  %v452_v4 = vmov 0.0   ;;  %s558_s27 = smov (!%p226_p10, %s365_s27), 3  ;;  %v242_v5 = vld [vmem:[%s198_s4] sm:$0xff]  ;;  %v243_v6 = vld [vmem:[%s198_s4 + $0x8] sm:$0xff]  ;;  %v244_v7 = vld [vmem:[%s198_s4 + $0x10] sm:$0xff] }
  0x1e   : > { %s367_s28 = sshll.u32 %s556_s11, 1  ;;  %s366_s5 = sshll.u32 %s558_s27, 3  ;;  %v245_v8 = vld [vmem:[%s198_s4 + $0x18] sm:$0xff] }
  0x1f   : > { %s520_s3 = scalar_lea.vmem %s548_s2, %s367_s28  ;;  %s229_s8 = scalar_lea.vmem %s547_s1, %s366_s5 }
  0x20   : > { %240 = vst [vmem:[%s520_s3] sm:$0x1] %v452_v4  ;;  %v246_v9 = vld [vmem:[%s229_s8] sm:$0xff]  ;;  %v247_v10 = vld [vmem:[%s229_s8 + $0x8] sm:$0xff] }
  0x21   : > { %241 = vst [vmem:[%s520_s3 + $0x1] sm:$0x1] %v452_v4  ;;  %v248_v11 = vsub.f32 %v242_v5, %v246_v9  ;;  %v249_v12 = vsub.f32 %v243_v6, %v247_v10  ;;  %v250_v13 = vsub.f32 %v244_v7, %v246_v9  ;;  %v251_v14 = vsub.f32 %v245_v8, %v247_v10 }
  0x23   : > { %v254_v15 = vmul.f32 %v248_v11, %v248_v11  ;;  %v255_v16 = vmul.f32 %v249_v12, %v249_v12  ;;  %v256_v17 = vmul.f32 %v250_v13, %v250_v13  ;;  %v257_v18 = vmul.f32 %v251_v14, %v251_v14 }
  0x25   : > { %v258_v19 = vadd.f32 %v255_v16, %v254_v15  ;;  %v265_v20 = vadd.f32 %v257_v18, %v256_v17 }
  0x27   : > { %v259_v21 = vrot.slane %v258_v19, 4  ;;  %v266_v22 = vrot.slane %v265_v20, 4  ;;  %v252_v31 = vld [vmem:[%s520_s3] sm:$0x1] }
  0x28   : > { %v253_v32 = vld [vmem:[%s520_s3 + $0x1] sm:$0x1] }
  0x29   : > { %v260_v23 = vadd.f32 %v259_v21, %v258_v19  ;;  %v267_v24 = vadd.f32 %v266_v22, %v265_v20 }
  0x2b   : > { %v261_v25 = vrot.slane %v260_v23, 2  ;;  %v268_v26 = vrot.slane %v267_v24, 2 }
  0x2d   : > { %v262_v27 = vadd.f32 %v261_v25, %v260_v23  ;;  %v269_v28 = vadd.f32 %v268_v26, %v267_v24 }
  0x2f   : > { %v263_v29 = vrot.slane %v262_v27, 1  ;;  %v270_v30 = vrot.slane %v269_v28, 1 }
  0x31   : > { %v264_v33 = vadd.f32 %v263_v29, %v262_v27  ;;  %v271_v34 = vadd.f32 %v270_v30, %v269_v28 }
  0x33   : > { %v272_v35 = vadd.f32 %v264_v33, %v252_v31  ;;  %v273_v36 = vadd.f32 %v271_v34, %v253_v32 }
  0x35   : > { %274 = vst [vmem:[%s520_s3] sm:$0x1] %v272_v35 }
  0x36   : > { %275 = vst [vmem:[%s520_s3 + $0x1] sm:$0x1] %v273_v36 }
  0x37 PF: > { %s12_s13 = sadd.s32 1, %s450_s13   ;;  %s549_s9 = smov %s438_s10 }
  0x38   : > { %p9_p11 = scmp.ge.s32.totalorder %s12_s13, 4   ;;  %s550_s10 = smov %s503_s17 }
  0x39   : > { %s551_s11 = smov %s446_s12  ;;  %s552_s12 = smov %s554_s14 }
  0x3a   :  { %11 = sbr.rel (!%p9_p11) target bundleno = 3 (0x3), region = 108 }

</bundles_post_ra>
